<compile_context>
chip_gen: v6e
topology: v6e:2x2x1
jax: 0.10.0
libtpu: 0.0.40
codegen_flags: <defaults>
</compile_context>

<pallas_src>
import functools

import jax
import jax.numpy as jnp
from jax.experimental import pallas as pl
from jax.experimental.pallas import tpu as pltpu

_LANES = 128
_SUBLANES = 8
_MAX_TILE_ROWS = 4096   # (4096, 128) f32 tile = 2 MiB per input per buffer


def _round_up(x, m):
    return ((x + m - 1) // m) * m


def _make_kernel(binary_targets: bool, from_logits: bool):
    def kernel(p_ref, t_ref, o_ref):
        # Zero the per-batch accumulator block at the first chunk.
        @pl.when(pl.program_id(1) == 0)
        def _():
            o_ref[...] = jnp.zeros_like(o_ref)

        x = p_ref[0].astype(jnp.float32)      # (tile_rows, 128)
        t = t_ref[0].astype(jnp.float32)      # (tile_rows, 128)

        if from_logits:
            p = 1.0 / (1.0 + jnp.exp(-x))
            if binary_targets:
                # -log(sigmoid(x)) if t==1 else -log(1-sigmoid(x)) == softplus(-+x)
                z = jnp.where(t > 0.5, -x, x)
                bce = jnp.maximum(z, 0.0) + jnp.log(1.0 + jnp.exp(-jnp.abs(z)))
            else:
                sp_neg = jnp.maximum(-x, 0.0) + jnp.log(1.0 + jnp.exp(-jnp.abs(x)))  # softplus(-x)
                sp_pos = sp_neg + x                                                   # softplus(x)
                bce = t * sp_neg + (1.0 - t) * sp_pos
        else:
            p = x
            if binary_targets:
                # One EUP log per element instead of two (exact for hard 0/1 targets).
                q = jnp.where(t > 0.5, p, 1.0 - p)
                bce = -jnp.maximum(jnp.log(q), -100.0)    # PyTorch BCELoss -100 clamp
            else:
                bce = -(t * jnp.maximum(jnp.log(p), -100.0)
                        + (1.0 - t) * jnp.maximum(jnp.log(1.0 - p), -100.0))

        inter = p * t
        union = p * p + (t if binary_targets else t * t)   # t*t == t for binary t

        # Fold (tile_rows, 128) -> (8, 128) with pure vreg-wise adds (no XLU).
        g = x.shape[0] // _SUBLANES

        def fold(v):
            return v.reshape(g, _SUBLANES, _LANES).sum(axis=0)

        o_ref[0, 0, :, :] += fold(bce)
        o_ref[0, 1, :, :] += fold(inter)
        o_ref[0, 2, :, :] += fold(union)

    return kernel


def _pad_and_reshape(x, n_pad_total, pad_value):
    b = x.shape[0]
    flat = x.reshape(b, -1)
    n = flat.shape[1]
    if n_pad_total > n:
        flat = jnp.pad(flat, ((0, 0), (0, n_pad_total - n)),
                       constant_values=pad_value)
    return flat.reshape(b, n_pad_total // _LANES, _LANES)


@functools.partial(jax.jit, static_argnames=(
    "alpha", "beta", "smooth", "binary_targets", "from_logits"))
def bce_dice_loss(inputs, targets, *, alpha=1.0, beta=1.0, smooth=1e-5,
                  binary_targets=True, from_logits=False):
    """BCE + Dice loss matching PyTorch BCEDiceLoss.forward.

    inputs:  (B, C, H, W) probabilities in (0, 1) — or raw logits if
             from_logits=True (sigmoid is then fused into the kernel).
    targets: (B, C, H, W) ground-truth mask. Use binary_targets=False for
             soft (non 0/1) targets (costs one extra log per element).
    Returns a scalar f32 loss.
    """
    b = inputs.shape[0]
    n_true = 1
    for d in inputs.shape[1:]:
        n_true *= d

    n_rows = pl.cdiv(n_true, _LANES)
    if n_rows <= _MAX_TILE_ROWS:
        tile_rows = _round_up(n_rows, _SUBLANES)
        r_pad = tile_rows
    else:
        tile_rows = _MAX_TILE_ROWS
        r_pad = _round_up(n_rows, tile_rows)
    num_chunks = r_pad // tile_rows
    n_pad_total = r_pad * _LANES

    # Pad values chosen so padded elements contribute exactly zero to all sums.
    p_pad_val = -1e4 if from_logits else 0.0
    p3 = _pad_and_reshape(inputs, n_pad_total, p_pad_val)
    t3 = _pad_and_reshape(targets, n_pad_total, 0)

    kernel = _make_kernel(bool(binary_targets), bool(from_logits))

    partial_sums = pl.pallas_call(
        kernel,
        out_shape=jax.ShapeDtypeStruct((b, 3, _SUBLANES, _LANES), jnp.float32),
        grid_spec=pltpu.PrefetchScalarGridSpec(
            num_scalar_prefetch=0,
            grid=(b, num_chunks),
            in_specs=[
                pl.BlockSpec((1, tile_rows, _LANES), lambda i, c: (i, c, 0)),
                pl.BlockSpec((1, tile_rows, _LANES), lambda i, c: (i, c, 0)),
            ],
            out_specs=pl.BlockSpec((1, 3, _SUBLANES, _LANES),
                                   lambda i, c: (i, 0, 0, 0)),
        ),
        compiler_params=pltpu.CompilerParams(
            dimension_semantics=("parallel", "arbitrary"),
            vmem_limit_bytes=32 * 1024 * 1024,
        ),
    )(p3, t3)

    # Tiny final combine in plain JAX (keeps XLU / cross-core combine out of
    # the hot loop; on v7x the two cores' per-batch partials merge here).
    sums = jnp.sum(partial_sums, axis=(2, 3))          # (B, 3)
    bce_loss = jnp.sum(sums[:, 0]) / float(b * n_true)
    inter = sums[:, 1]
    union = sums[:, 2]
    dice_coeff = (2.0 * inter + smooth) / (union + smooth)
    dice_loss = jnp.mean(1.0 - dice_coeff)
    return (alpha * bce_loss + beta * dice_loss).astype(jnp.float32)


def _reference(probs, targets, alpha=1.0, beta=1.0, smooth=1e-5):
    b = probs.shape[0]
    p = probs.reshape(b, -1).astype(jnp.float32)
    t = targets.reshape(b, -1).astype(jnp.float32)
    bce = jnp.mean(-(t * jnp.maximum(jnp.log(p), -100.0)
                     + (1.0 - t) * jnp.maximum(jnp.log(1.0 - p), -100.0)))
    inter = jnp.sum(p * t, axis=1)
    union = jnp.sum(p * p, axis=1) + jnp.sum(t * t, axis=1)
    dice = 1.0 - (2.0 * inter + smooth) / (union + smooth)
    return alpha * bce + beta * jnp.mean(dice)


if __name__ == "__main__":
    key = jax.random.PRNGKey(0)
    k1, k2, k3, k4, k5 = jax.random.split(key, 5)

    # Shapes implied by the module spec.
    B, C, H, W = 2, 4, 16, 16
    logits = jax.random.normal(k1, (B, C, H, W), dtype=jnp.float32)
    probs = jax.nn.sigmoid(logits)
    target = (jax.random.uniform(k2, (B, C, H, W)) > 0.5).astype(jnp.float32)
    ref = _reference(probs, target)

    # 1) Default path: probabilities in, hard binary targets.
    loss = bce_dice_loss(probs, target)
    jax.block_until_ready(loss)
    assert jnp.allclose(loss, ref, rtol=1e-5, atol=1e-5), (loss, ref)

    # 2) Fused-sigmoid path: raw logits in.
    loss_lg = bce_dice_loss(logits, target, from_logits=True)
    assert jnp.allclose(loss_lg, ref, rtol=1e-5, atol=1e-5), (loss_lg, ref)

    # 3) bf16 activations fed directly (no wrapper upcast; f32 math in-kernel).
    probs_bf16 = probs.astype(jnp.bfloat16)
    ref_bf16 = _reference(probs_bf16, target)
    loss_bf16 = bce_dice_loss(probs_bf16, target)
    assert jnp.allclose(loss_bf16, ref_bf16, rtol=1e-4, atol=1e-5), (loss_bf16, ref_bf16)

    # 4) Flattened length not a multiple of 8*128 (exercises zero-padding path).
    B2, C2, H2, W2 = 2, 3, 10, 10
    probs2 = jax.nn.sigmoid(jax.random.normal(k3, (B2, C2, H2, W2), dtype=jnp.float32))
    target2 = (jax.random.uniform(k4, (B2, C2, H2, W2)) > 0.5).astype(jnp.float32)
    loss2 = bce_dice_loss(probs2, target2)
    assert jnp.allclose(loss2, _reference(probs2, target2), rtol=1e-5, atol=1e-5)

    # 5) Soft (non-binary) targets — PyTorch BCELoss also accepts these.
    target_soft = jax.random.uniform(k5, (B, C, H, W), dtype=jnp.float32)
    loss3 = bce_dice_loss(probs, target_soft, binary_targets=False)
    assert jnp.allclose(loss3, _reference(probs, target_soft), rtol=1e-5, atol=1e-5)

    jax.block_until_ready((loss, loss_lg, loss_bf16, loss2, loss3))
    print("KERNEL_OK")
</pallas_src>

<mosaic_0001>
module attributes {stable_mosaic.version = 11 : i64} {
  func.func @kernel(%arg0: i32, %arg1: i32, %arg2: memref<1x8x128xf32, #tpu.memory_space<vmem>>, %arg3: memref<1x8x128xf32, #tpu.memory_space<vmem>>, %arg4: memref<1x3x8x128xf32, #tpu.memory_space<vmem>>) attributes {dimension_semantics = [#tpu.dimension_semantics<parallel>, #tpu.dimension_semantics<arbitrary>], iteration_bounds = array<i64: 2, 1>, scalar_prefetch = 0 : i64, scratch_operands = 0 : i64, tpu.core_type = #tpu.core_type<tc>, window_params = [{transform_indices = @transform_0, window_bounds = array<i64: 1, 8, 128>}, {transform_indices = @transform_1, window_bounds = array<i64: 1, 8, 128>}, {transform_indices = @transform_2, window_bounds = array<i64: 1, 3, 8, 128>}]} {
    %c0_i32 = arith.constant 0 : i32
    %0 = arith.cmpi eq, %arg1, %c0_i32 : i32
    %1 = arith.extui %0 : i1 to i32
    %c0_i32_0 = arith.constant 0 : i32
    %2 = arith.cmpi ne, %1, %c0_i32_0 : i32
    scf.if %2 {
      %cst_34 = arith.constant 0.000000e+00 : f32
      %44 = vector.broadcast %cst_34 : f32 to vector<1x3x8x128xf32>
      %c0_35 = arith.constant 0 : index
      %c0_36 = arith.constant 0 : index
      %c0_37 = arith.constant 0 : index
      %c0_38 = arith.constant 0 : index
      %45 = vector.load %arg4[%c0_35, %c0_36, %c0_37, %c0_38] : memref<1x3x8x128xf32, #tpu.memory_space<vmem>>, vector<1x3x8x128xf32>
      tpu.vector_store %arg4[%c0_35, %c0_36, %c0_37, %c0_38], %44 {strides = array<i32>} : memref<1x3x8x128xf32, #tpu.memory_space<vmem>>, vector<1x3x8x128xf32>,
    } else {
    }
    %c0 = arith.constant 0 : index
    %c0_1 = arith.constant 0 : index
    %c0_2 = arith.constant 0 : index
    %3 = vector.load %arg2[%c0, %c0_1, %c0_2] : memref<1x8x128xf32, #tpu.memory_space<vmem>>, vector<1x8x128xf32>
    %4 = vector.shape_cast %3 : vector<1x8x128xf32> to vector<8x128xf32>
    %c0_3 = arith.constant 0 : index
    %c0_4 = arith.constant 0 : index
    %c0_5 = arith.constant 0 : index
    %5 = vector.load %arg3[%c0_3, %c0_4, %c0_5] : memref<1x8x128xf32, #tpu.memory_space<vmem>>, vector<1x8x128xf32>
    %6 = vector.shape_cast %5 : vector<1x8x128xf32> to vector<8x128xf32>
    %cst = arith.constant 5.000000e-01 : f32
    %7 = vector.broadcast %cst : f32 to vector<8x128xf32>
    %8 = arith.cmpf ogt, %6, %7 : vector<8x128xf32>
    %cst_6 = arith.constant 1.000000e+00 : f32
    %9 = vector.broadcast %cst_6 : f32 to vector<8x128xf32>
    %10 = arith.subf %9, %4 : vector<8x128xf32>
    %11 = arith.select %8, %4, %10 : vector<8x128xi1>, vector<8x128xf32>
    %12 = math.log %11 : vector<8x128xf32>
    %cst_7 = arith.constant -1.000000e+02 : f32
    %13 = vector.broadcast %cst_7 : f32 to vector<8x128xf32>
    %14 = arith.maximumf %12, %13 : vector<8x128xf32>
    %cst_8 = arith.constant 0.000000e+00 : f32
    %15 = vector.broadcast %cst_8 : f32 to vector<8x128xf32>
    %16 = arith.subf %15, %14 : vector<8x128xf32>
    %17 = arith.mulf %4, %6 : vector<8x128xf32>
    %18 = arith.mulf %4, %4 : vector<8x128xf32>
    %19 = arith.addf %18, %6 : vector<8x128xf32>
    %c0_9 = arith.constant 0 : index
    %c0_10 = arith.constant 0 : index
    %c0_11 = arith.constant 0 : index
    %c0_12 = arith.constant 0 : index
    %20 = vector.load %arg4[%c0_9, %c0_10, %c0_11, %c0_12] : memref<1x3x8x128xf32, #tpu.memory_space<vmem>>, vector<1x1x8x128xf32>
    %21 = vector.shape_cast %20 : vector<1x1x8x128xf32> to vector<8x128xf32>
    %22 = vector.shape_cast %16 : vector<8x128xf32> to vector<1x8x128xf32>
    %cst_13 = arith.constant dense<0.000000e+00> : vector<8x128xf32>
    %23 = vector.multi_reduction <add>, %22, %cst_13 [0] : vector<1x8x128xf32> to vector<8x128xf32>
    %24 = arith.addf %21, %23 : vector<8x128xf32>
    %c0_14 = arith.constant 0 : index
    %c0_15 = arith.constant 0 : index
    %c0_16 = arith.constant 0 : index
    %c0_17 = arith.constant 0 : index
    %25 = vector.load %arg4[%c0_14, %c0_15, %c0_16, %c0_17] : memref<1x3x8x128xf32, #tpu.memory_space<vmem>>, vector<1x1x8x128xf32>
    %26 = vector.shape_cast %25 : vector<1x1x8x128xf32> to vector<8x128xf32>
    %27 = vector.shape_cast %24 : vector<8x128xf32> to vector<1x1x8x128xf32>
    tpu.vector_store %arg4[%c0_14, %c0_15, %c0_16, %c0_17], %27 {strides = array<i32>} : memref<1x3x8x128xf32, #tpu.memory_space<vmem>>, vector<1x1x8x128xf32>,
    %c0_18 = arith.constant 0 : index
    %c1 = arith.constant 1 : index
    %c0_19 = arith.constant 0 : index
    %c0_20 = arith.constant 0 : index
    %28 = vector.load %arg4[%c0_18, %c1, %c0_19, %c0_20] : memref<1x3x8x128xf32, #tpu.memory_space<vmem>>, vector<1x1x8x128xf32>
    %29 = vector.shape_cast %28 : vector<1x1x8x128xf32> to vector<8x128xf32>
    %30 = vector.shape_cast %17 : vector<8x128xf32> to vector<1x8x128xf32>
    %cst_21 = arith.constant dense<0.000000e+00> : vector<8x128xf32>
    %31 = vector.multi_reduction <add>, %30, %cst_21 [0] : vector<1x8x128xf32> to vector<8x128xf32>
    %32 = arith.addf %29, %31 : vector<8x128xf32>
    %c0_22 = arith.constant 0 : index
    %c1_23 = arith.constant 1 : index
    %c0_24 = arith.constant 0 : index
    %c0_25 = arith.constant 0 : index
    %33 = vector.load %arg4[%c0_22, %c1_23, %c0_24, %c0_25] : memref<1x3x8x128xf32, #tpu.memory_space<vmem>>, vector<1x1x8x128xf32>
    %34 = vector.shape_cast %33 : vector<1x1x8x128xf32> to vector<8x128xf32>
    %35 = vector.shape_cast %32 : vector<8x128xf32> to vector<1x1x8x128xf32>
    tpu.vector_store %arg4[%c0_22, %c1_23, %c0_24, %c0_25], %35 {strides = array<i32>} : memref<1x3x8x128xf32, #tpu.memory_space<vmem>>, vector<1x1x8x128xf32>,
    %c0_26 = arith.constant 0 : index
    %c2 = arith.constant 2 : index
    %c0_27 = arith.constant 0 : index
    %c0_28 = arith.constant 0 : index
    %36 = vector.load %arg4[%c0_26, %c2, %c0_27, %c0_28] : memref<1x3x8x128xf32, #tpu.memory_space<vmem>>, vector<1x1x8x128xf32>
    %37 = vector.shape_cast %36 : vector<1x1x8x128xf32> to vector<8x128xf32>
    %38 = vector.shape_cast %19 : vector<8x128xf32> to vector<1x8x128xf32>
    %cst_29 = arith.constant dense<0.000000e+00> : vector<8x128xf32>
    %39 = vector.multi_reduction <add>, %38, %cst_29 [0] : vector<1x8x128xf32> to vector<8x128xf32>
    %40 = arith.addf %37, %39 : vector<8x128xf32>
    %c0_30 = arith.constant 0 : index
    %c2_31 = arith.constant 2 : index
    %c0_32 = arith.constant 0 : index
    %c0_33 = arith.constant 0 : index
    %41 = vector.load %arg4[%c0_30, %c2_31, %c0_32, %c0_33] : memref<1x3x8x128xf32, #tpu.memory_space<vmem>>, vector<1x1x8x128xf32>
    %42 = vector.shape_cast %41 : vector<1x1x8x128xf32> to vector<8x128xf32>
    %43 = vector.shape_cast %40 : vector<8x128xf32> to vector<1x1x8x128xf32>
    tpu.vector_store %arg4[%c0_30, %c2_31, %c0_32, %c0_33], %43 {strides = array<i32>} : memref<1x3x8x128xf32, #tpu.memory_space<vmem>>, vector<1x1x8x128xf32>,
    return
  }
  func.func @transform_0(%arg0: i32, %arg1: i32) -> (i32, i32, i32) {
    %c0_i32 = arith.constant 0 : i32
    %c0_i32_0 = arith.constant 0 : i32
    return %arg0, %arg1, %c0_i32 : i32, i32, i32
  }
  func.func @transform_1(%arg0: i32, %arg1: i32) -> (i32, i32, i32) {
    %c0_i32 = arith.constant 0 : i32
    %c0_i32_0 = arith.constant 0 : i32
    return %arg0, %arg1, %c0_i32 : i32, i32, i32
  }
  func.func @transform_2(%arg0: i32, %arg1: i32) -> (i32, i32, i32, i32) {
    %c0_i32 = arith.constant 0 : i32
    %c0_i32_0 = arith.constant 0 : i32
    %c0_i32_1 = arith.constant 0 : i32
    %c0_i32_2 = arith.constant 0 : i32
    return %arg0, %c0_i32, %c0_i32_0, %c0_i32_1 : i32, i32, i32, i32
  }
}

</mosaic_0001>

<bundles_post_ra>
// kernel: bce_dice_loss.1
= control target key start
LH: loop header
LB: loop body
LE: loop exit
PB: predicated region body
PF: predicated region fallthrough
CT: control target
= control target key end

     0   :  { %s387_s9 = smov 0   ;;  %s389_s10 = smov 0   ;;  %s423_s0 = inlined_call_operand.vmem [shape: f32[2,8,128], index: 0, kind: input, shape index: {}]   ;;  %s424_s1 = inlined_call_operand.vmem [shape: f32[2,8,128], index: 1, kind: input, shape index: {}]   ;;  %s425_s2 = inlined_call_operand.vmem [shape: f32[2,3,8,128], index: 2, kind: output, shape index: {}]  }
   0x1   :  { %s391_s11 = smov 0  }
   0x2 LB: > { %s24_s12 = sadd.s32 1, %s366_s10  ;;  %p310_p0 = scmp.ge.s32.totalorder %s370_s11, 1  ;;  %s370_s11 = sphi %s391_s11, %s12_s11   ;;  %s366_s10 = sphi %s389_s10, %s427_s10   ;;  %s362_s9 = sphi %s387_s9, %s426_s9  }
   0x3   : > { %p26_p1 = scmp.ge.s32.totalorder %s24_s12, 2  ;;  %p142_p2 = scmp.lt.s32.totalorder %s370_s11, 3 }
   0x5   : > { %s429_s12 = smov (%p26_p1, %s24_s12), 0  ;;  %p143_p3 = pnand %p310_p0, %p142_p2 }
   0x6   : > { %p173_p4 = scmp.lt.s32.totalorder (!%p143_p3), %s362_s9, 1 }
   0x7   : > { %146 = sbr.rel (%p143_p3) target bundleno = 40 (0x28), region = 28 }
   0xc   : > { %s431_s9 = smov (!%p173_p4, %s362_s9), 1 }
   0xd   : > { %s320_s13 = smul.u32 24, %s431_s9  ;;  %s311_s14 = sshll.u32 %s431_s9, 3 }
   0xe   : > { %s179_s17 = scalar_lea.vmem %s423_s0, %s311_s14  ;;  %s186_s20 = scalar_lea.vmem %s424_s1, %s311_s14 }
   0xf   : > { %v199_v0 = vld [vmem:[%s179_s17] sm:$0xff]  ;;  %s191_s23 = scalar_lea.vmem %s425_s2, %s320_s13 }
  0x10   : > { %v200_v1 = vld [vmem:[%s186_s20] sm:$0xff]  ;;  %v202_v2 = vsub.f32 1.0, %v199_v0  ;;  %v209_v4 = vmul.f32 %v199_v0, %v199_v0 }
  0x11   : > { %vm201_vm0 = vcmp.gt.f32.partialorder %v200_v1, 0.5  ;;  %v208_v3 = vmul.f32 %v200_v1, %v199_v0 }
  0x12   : > { %v203_v5 = vsel %vm201_vm0, %v199_v0, %v202_v2  ;;  %v210_v6 = vadd.f32 %v209_v4, %v200_v1 }
  0x13   : > { %346 = vlog2.f32 %v203_v5  ;;  %315 = vst [vmem:[%s191_s23 + $0x8] sm:$0xff] %v208_v3 }
  0x14   : > { %317 = vst [vmem:[%s191_s23 + $0x10] sm:$0xff] %v210_v6 }
  0x20   : > { %v347_v7 = vpop.eup %346 }
  0x21   : > { %v205_v8 = vmul.f32 0.6931472, %v347_v7 }
  0x23   : > { %v206_v9 = vmax.f32 %v205_v8, -100.0 }
  0x25   : > { %v207_v10 = vsub.f32 0.0, %v206_v9 }
  0x27   : > { %214 = vst [vmem:[%s191_s23] sm:$0xff] %v207_v10 }
  0x28 PF: > { %s12_s11 = sadd.s32 1, %s370_s11   ;;  %s426_s9 = smov %s366_s10 }
  0x29   : > { %p9_p5 = scmp.ge.s32.totalorder %s12_s11, 4   ;;  %s427_s10 = smov %s429_s12 }
  0x2b   :  { %11 = sbr.rel (!%p9_p5) target bundleno = 2 (0x2), region = 67 }

</bundles_post_ra>
